<compile_context>
chip_gen: v5e
topology: v5e:2x2
jax: 0.10.0
libtpu: 0.0.40
codegen_flags: <defaults>
</compile_context>

<pallas_src>
import functools

import jax
import jax.numpy as jnp
from jax.experimental import pallas as pl
from jax.experimental.pallas import tpu as pltpu


HIDDEN = 128
LANE = 128


def _round_up(n, m):
    return (n + m - 1) // m * m


def dqn_kernel(x_ref,
               w0_ref, b0_ref,
               w1_ref, b1_ref,
               w2_ref, b2_ref,
               w3_ref, b3_ref,
               w4_ref, b4_ref,
               w5_ref, b5_ref,
               o_ref):
    """Fused 6-layer MLP: (Linear+ReLU) x5 then Linear, all operands in VMEM."""
    h = x_ref[...]  # (TB, in_pad) float32 (zero-padded lanes)

    def linear(h, w_ref, b_ref, relu):
        # bf16 matmul inputs drive the bf16 MXU path; accumulate in f32.
        y = jnp.dot(h.astype(w_ref.dtype), w_ref[...],
                    preferred_element_type=jnp.float32)
        y = y + b_ref[...]            # bias add + ReLU stay in f32 (v5e-friendly)
        return jnp.maximum(y, 0.0) if relu else y

    h = linear(h, w0_ref, b0_ref, True)
    h = linear(h, w1_ref, b1_ref, True)
    h = linear(h, w2_ref, b2_ref, True)
    h = linear(h, w3_ref, b3_ref, True)
    h = linear(h, w4_ref, b4_ref, True)
    o_ref[...] = linear(h, w5_ref, b5_ref, False).astype(o_ref.dtype)


def init_params(key, input_size, outputs, hidden=HIDDEN):
    """Synthetic f32 parameters matching the PyTorch module's shapes.

    Returns a list of (W, b) with W shaped (in_features, out_features)
    (i.e. nn.Linear weight transposed) and b shaped (out_features,).
    """
    dims = [input_size, hidden, hidden, hidden, hidden, hidden, outputs]
    params = []
    for i in range(6):
        key, kw, kb = jax.random.split(key, 3)
        fan_in, fan_out = dims[i], dims[i + 1]
        bound = 1.0 / jnp.sqrt(jnp.float32(fan_in))
        w = jax.random.uniform(kw, (fan_in, fan_out), jnp.float32, -bound, bound)
        b = jax.random.uniform(kb, (fan_out,), jnp.float32, -bound, bound)
        params.append((w, b))
    return params


def prepare_params(params, weight_dtype=jnp.bfloat16):
    """Zero-pad first/last layers to 128 lanes and cast weights to bf16.

    Padded rows of W0 and padded cols of W5/b5 are zero, so the padded lanes
    contribute exactly zero to the result.
    """
    prepared = []
    n_layers = len(params)
    for i, (w, b) in enumerate(params):
        in_f, out_f = w.shape
        in_pad = _round_up(in_f, LANE) if i == 0 else in_f
        out_pad = _round_up(out_f, LANE) if i == n_layers - 1 else out_f
        w_p = jnp.zeros((in_pad, out_pad), jnp.float32).at[:in_f, :out_f].set(w)
        b_p = jnp.zeros((1, out_pad), jnp.float32).at[0, :out_f].set(b)
        prepared.append((w_p.astype(weight_dtype), b_p))
    return prepared


@functools.partial(jax.jit, static_argnames=("outputs", "tb"))
def dqn_forward(x, prepared_params, *, outputs, tb=128):
    """x: (B, input_size) float32. prepared_params: output of prepare_params."""
    B, in_f = x.shape
    in_pad = prepared_params[0][0].shape[0]
    out_pad = prepared_params[-1][0].shape[1]

    # Lane-dense, batch-tile-aligned input: zero-pad features and batch rows.
    b_pad = _round_up(max(B, 1), tb)
    x_p = jnp.zeros((b_pad, in_pad), jnp.float32).at[:B, :in_f].set(x)

    n_tiles = pl.cdiv(b_pad, tb)

    flat_args = [x_p]
    in_specs = [pl.BlockSpec((tb, in_pad), lambda i: (i, 0))]
    for (w, b) in prepared_params:
        flat_args += [w, b]
        # Weights/biases: constant index_map -> fetched once, VMEM-resident.
        in_specs += [pl.BlockSpec(w.shape, lambda i: (0, 0)),
                     pl.BlockSpec(b.shape, lambda i: (0, 0))]

    flops = 2 * b_pad * sum(int(w.shape[0]) * int(w.shape[1])
                            for w, _ in prepared_params)
    bytes_accessed = (x_p.size * 4 + b_pad * out_pad * 4 +
                      sum(w.size * w.dtype.itemsize + b.size * 4
                          for w, b in prepared_params))

    out_p = pl.pallas_call(
        dqn_kernel,
        out_shape=jax.ShapeDtypeStruct((b_pad, out_pad), jnp.float32),
        grid=(n_tiles,),
        in_specs=in_specs,
        out_specs=pl.BlockSpec((tb, out_pad), lambda i: (i, 0)),
        compiler_params=pltpu.CompilerParams(
            dimension_semantics=("parallel",)),
        cost_estimate=pl.CostEstimate(flops=flops, transcendentals=0,
                                      bytes_accessed=bytes_accessed),
    )(*flat_args)

    return out_p[:B, :outputs]


def dqn_reference(x, prepared_params, outputs):
    """Pure-JAX reference using the exact same (bf16-weight, f32-acc) arithmetic."""
    B, in_f = x.shape
    in_pad = prepared_params[0][0].shape[0]
    h = jnp.zeros((B, in_pad), jnp.float32).at[:, :in_f].set(x)
    for i, (w, b) in enumerate(prepared_params):
        h = jnp.dot(h.astype(w.dtype), w,
                    preferred_element_type=jnp.float32) + b
        if i < len(prepared_params) - 1:
            h = jnp.maximum(h, 0.0)
    return h[:, :outputs]


if __name__ == "__main__":
    key = jax.random.PRNGKey(0)
    k_x, k_p = jax.random.split(key)

    batch = 256          # two 128-row tiles -> exercises the batch grid
    input_size = 16
    outputs = 4

    x = jax.random.normal(k_x, (batch, input_size), jnp.float32)
    raw_params = init_params(k_p, input_size, outputs)
    params = prepare_params(raw_params)

    y = dqn_forward(x, params, outputs=outputs, tb=128)
    y = jax.block_until_ready(y)

    y_ref = dqn_reference(x, params, outputs)
    assert y.shape == (batch, outputs)
    assert jnp.allclose(y, y_ref, atol=1e-4, rtol=1e-4), "mismatch vs reference"

    print("KERNEL_OK")
</pallas_src>

<mosaic_0001>
module attributes {stable_mosaic.version = 11 : i64} {
  func.func @dqn_kernel(%arg0: i32, %arg1: memref<128x128xf32, #tpu.memory_space<vmem>>, %arg2: memref<128x128xbf16, #tpu.memory_space<vmem>>, %arg3: memref<1x128xf32, #tpu.memory_space<vmem>>, %arg4: memref<128x128xbf16, #tpu.memory_space<vmem>>, %arg5: memref<1x128xf32, #tpu.memory_space<vmem>>, %arg6: memref<128x128xbf16, #tpu.memory_space<vmem>>, %arg7: memref<1x128xf32, #tpu.memory_space<vmem>>, %arg8: memref<128x128xbf16, #tpu.memory_space<vmem>>, %arg9: memref<1x128xf32, #tpu.memory_space<vmem>>, %arg10: memref<128x128xbf16, #tpu.memory_space<vmem>>, %arg11: memref<1x128xf32, #tpu.memory_space<vmem>>, %arg12: memref<128x128xbf16, #tpu.memory_space<vmem>>, %arg13: memref<1x128xf32, #tpu.memory_space<vmem>>, %arg14: memref<128x128xf32, #tpu.memory_space<vmem>>) attributes {dimension_semantics = [#tpu.dimension_semantics<parallel>], iteration_bounds = array<i64: 2>, scalar_prefetch = 0 : i64, scratch_operands = 0 : i64, tpu.core_type = #tpu.core_type<tc>, window_params = [{transform_indices = @transform_0, window_bounds = array<i64: 128, 128>}, {pipeline_mode = #tpu.pipeline_mode<synchronous>, transform_indices = @transform_1, window_bounds = array<i64: 128, 128>}, {pipeline_mode = #tpu.pipeline_mode<synchronous>, transform_indices = @transform_2, window_bounds = array<i64: 1, 128>}, {pipeline_mode = #tpu.pipeline_mode<synchronous>, transform_indices = @transform_3, window_bounds = array<i64: 128, 128>}, {pipeline_mode = #tpu.pipeline_mode<synchronous>, transform_indices = @transform_4, window_bounds = array<i64: 1, 128>}, {pipeline_mode = #tpu.pipeline_mode<synchronous>, transform_indices = @transform_5, window_bounds = array<i64: 128, 128>}, {pipeline_mode = #tpu.pipeline_mode<synchronous>, transform_indices = @transform_6, window_bounds = array<i64: 1, 128>}, {pipeline_mode = #tpu.pipeline_mode<synchronous>, transform_indices = @transform_7, window_bounds = array<i64: 128, 128>}, {pipeline_mode = #tpu.pipeline_mode<synchronous>, transform_indices = @transform_8, window_bounds = array<i64: 1, 128>}, {pipeline_mode = #tpu.pipeline_mode<synchronous>, transform_indices = @transform_9, window_bounds = array<i64: 128, 128>}, {pipeline_mode = #tpu.pipeline_mode<synchronous>, transform_indices = @transform_10, window_bounds = array<i64: 1, 128>}, {pipeline_mode = #tpu.pipeline_mode<synchronous>, transform_indices = @transform_11, window_bounds = array<i64: 128, 128>}, {pipeline_mode = #tpu.pipeline_mode<synchronous>, transform_indices = @transform_12, window_bounds = array<i64: 1, 128>}, {transform_indices = @transform_13, window_bounds = array<i64: 128, 128>}]} {
    %c0 = arith.constant 0 : index
    %c0_0 = arith.constant 0 : index
    %0 = vector.load %arg1[%c0, %c0_0] : memref<128x128xf32, #tpu.memory_space<vmem>>, vector<128x128xf32>
    %1 = arith.truncf %0 : vector<128x128xf32> to vector<128x128xbf16>
    %c0_1 = arith.constant 0 : index
    %c0_2 = arith.constant 0 : index
    %2 = vector.load %arg2[%c0_1, %c0_2] : memref<128x128xbf16, #tpu.memory_space<vmem>>, vector<128x128xbf16>
    %cst = arith.constant dense<0.000000e+00> : vector<128x128xf32>
    %3 = tpu.matmul %1, %2, %cst {dimension_numbers = #tpu.dot_dimension_numbers<[1], [0], [0], [1], [0, 0, 1, 1], [], []>} : vector<128x128xbf16>, vector<128x128xbf16>, vector<128x128xf32> -> vector<128x128xf32>
    %c0_3 = arith.constant 0 : index
    %c0_4 = arith.constant 0 : index
    %4 = vector.load %arg3[%c0_3, %c0_4] : memref<1x128xf32, #tpu.memory_space<vmem>>, vector<1x128xf32>
    %5 = vector.broadcast %4 : vector<1x128xf32> to vector<128x128xf32>
    %6 = arith.addf %3, %5 : vector<128x128xf32>
    %cst_5 = arith.constant 0.000000e+00 : f32
    %7 = vector.broadcast %cst_5 : f32 to vector<128x128xf32>
    %8 = arith.maximumf %6, %7 : vector<128x128xf32>
    %9 = arith.truncf %8 : vector<128x128xf32> to vector<128x128xbf16>
    %c0_6 = arith.constant 0 : index
    %c0_7 = arith.constant 0 : index
    %10 = vector.load %arg4[%c0_6, %c0_7] : memref<128x128xbf16, #tpu.memory_space<vmem>>, vector<128x128xbf16>
    %cst_8 = arith.constant dense<0.000000e+00> : vector<128x128xf32>
    %11 = tpu.matmul %9, %10, %cst_8 {dimension_numbers = #tpu.dot_dimension_numbers<[1], [0], [0], [1], [0, 0, 1, 1], [], []>} : vector<128x128xbf16>, vector<128x128xbf16>, vector<128x128xf32> -> vector<128x128xf32>
    %c0_9 = arith.constant 0 : index
    %c0_10 = arith.constant 0 : index
    %12 = vector.load %arg5[%c0_9, %c0_10] : memref<1x128xf32, #tpu.memory_space<vmem>>, vector<1x128xf32>
    %13 = vector.broadcast %12 : vector<1x128xf32> to vector<128x128xf32>
    %14 = arith.addf %11, %13 : vector<128x128xf32>
    %cst_11 = arith.constant 0.000000e+00 : f32
    %15 = vector.broadcast %cst_11 : f32 to vector<128x128xf32>
    %16 = arith.maximumf %14, %15 : vector<128x128xf32>
    %17 = arith.truncf %16 : vector<128x128xf32> to vector<128x128xbf16>
    %c0_12 = arith.constant 0 : index
    %c0_13 = arith.constant 0 : index
    %18 = vector.load %arg6[%c0_12, %c0_13] : memref<128x128xbf16, #tpu.memory_space<vmem>>, vector<128x128xbf16>
    %cst_14 = arith.constant dense<0.000000e+00> : vector<128x128xf32>
    %19 = tpu.matmul %17, %18, %cst_14 {dimension_numbers = #tpu.dot_dimension_numbers<[1], [0], [0], [1], [0, 0, 1, 1], [], []>} : vector<128x128xbf16>, vector<128x128xbf16>, vector<128x128xf32> -> vector<128x128xf32>
    %c0_15 = arith.constant 0 : index
    %c0_16 = arith.constant 0 : index
    %20 = vector.load %arg7[%c0_15, %c0_16] : memref<1x128xf32, #tpu.memory_space<vmem>>, vector<1x128xf32>
    %21 = vector.broadcast %20 : vector<1x128xf32> to vector<128x128xf32>
    %22 = arith.addf %19, %21 : vector<128x128xf32>
    %cst_17 = arith.constant 0.000000e+00 : f32
    %23 = vector.broadcast %cst_17 : f32 to vector<128x128xf32>
    %24 = arith.maximumf %22, %23 : vector<128x128xf32>
    %25 = arith.truncf %24 : vector<128x128xf32> to vector<128x128xbf16>
    %c0_18 = arith.constant 0 : index
    %c0_19 = arith.constant 0 : index
    %26 = vector.load %arg8[%c0_18, %c0_19] : memref<128x128xbf16, #tpu.memory_space<vmem>>, vector<128x128xbf16>
    %cst_20 = arith.constant dense<0.000000e+00> : vector<128x128xf32>
    %27 = tpu.matmul %25, %26, %cst_20 {dimension_numbers = #tpu.dot_dimension_numbers<[1], [0], [0], [1], [0, 0, 1, 1], [], []>} : vector<128x128xbf16>, vector<128x128xbf16>, vector<128x128xf32> -> vector<128x128xf32>
    %c0_21 = arith.constant 0 : index
    %c0_22 = arith.constant 0 : index
    %28 = vector.load %arg9[%c0_21, %c0_22] : memref<1x128xf32, #tpu.memory_space<vmem>>, vector<1x128xf32>
    %29 = vector.broadcast %28 : vector<1x128xf32> to vector<128x128xf32>
    %30 = arith.addf %27, %29 : vector<128x128xf32>
    %cst_23 = arith.constant 0.000000e+00 : f32
    %31 = vector.broadcast %cst_23 : f32 to vector<128x128xf32>
    %32 = arith.maximumf %30, %31 : vector<128x128xf32>
    %33 = arith.truncf %32 : vector<128x128xf32> to vector<128x128xbf16>
    %c0_24 = arith.constant 0 : index
    %c0_25 = arith.constant 0 : index
    %34 = vector.load %arg10[%c0_24, %c0_25] : memref<128x128xbf16, #tpu.memory_space<vmem>>, vector<128x128xbf16>
    %cst_26 = arith.constant dense<0.000000e+00> : vector<128x128xf32>
    %35 = tpu.matmul %33, %34, %cst_26 {dimension_numbers = #tpu.dot_dimension_numbers<[1], [0], [0], [1], [0, 0, 1, 1], [], []>} : vector<128x128xbf16>, vector<128x128xbf16>, vector<128x128xf32> -> vector<128x128xf32>
    %c0_27 = arith.constant 0 : index
    %c0_28 = arith.constant 0 : index
    %36 = vector.load %arg11[%c0_27, %c0_28] : memref<1x128xf32, #tpu.memory_space<vmem>>, vector<1x128xf32>
    %37 = vector.broadcast %36 : vector<1x128xf32> to vector<128x128xf32>
    %38 = arith.addf %35, %37 : vector<128x128xf32>
    %cst_29 = arith.constant 0.000000e+00 : f32
    %39 = vector.broadcast %cst_29 : f32 to vector<128x128xf32>
    %40 = arith.maximumf %38, %39 : vector<128x128xf32>
    %41 = arith.truncf %40 : vector<128x128xf32> to vector<128x128xbf16>
    %c0_30 = arith.constant 0 : index
    %c0_31 = arith.constant 0 : index
    %42 = vector.load %arg12[%c0_30, %c0_31] : memref<128x128xbf16, #tpu.memory_space<vmem>>, vector<128x128xbf16>
    %cst_32 = arith.constant dense<0.000000e+00> : vector<128x128xf32>
    %43 = tpu.matmul %41, %42, %cst_32 {dimension_numbers = #tpu.dot_dimension_numbers<[1], [0], [0], [1], [0, 0, 1, 1], [], []>} : vector<128x128xbf16>, vector<128x128xbf16>, vector<128x128xf32> -> vector<128x128xf32>
    %c0_33 = arith.constant 0 : index
    %c0_34 = arith.constant 0 : index
    %44 = vector.load %arg13[%c0_33, %c0_34] : memref<1x128xf32, #tpu.memory_space<vmem>>, vector<1x128xf32>
    %45 = vector.broadcast %44 : vector<1x128xf32> to vector<128x128xf32>
    %46 = arith.addf %43, %45 : vector<128x128xf32>
    %c0_35 = arith.constant 0 : index
    %c0_36 = arith.constant 0 : index
    %47 = vector.load %arg14[%c0_35, %c0_36] : memref<128x128xf32, #tpu.memory_space<vmem>>, vector<128x128xf32>
    tpu.vector_store %arg14[%c0_35, %c0_36], %46 {strides = array<i32>} : memref<128x128xf32, #tpu.memory_space<vmem>>, vector<128x128xf32>,
    return
  }
  func.func @transform_0(%arg0: i32) -> (i32, i32) {
    %c0_i32 = arith.constant 0 : i32
    %c0_i32_0 = arith.constant 0 : i32
    return %arg0, %c0_i32 : i32, i32
  }
  func.func @transform_1(%arg0: i32) -> (i32, i32) {
    %c0_i32 = arith.constant 0 : i32
    %c0_i32_0 = arith.constant 0 : i32
    %c0_i32_1 = arith.constant 0 : i32
    return %c0_i32, %c0_i32_0 : i32, i32
  }
  func.func @transform_2(%arg0: i32) -> (i32, i32) {
    %c0_i32 = arith.constant 0 : i32
    %c0_i32_0 = arith.constant 0 : i32
    %c0_i32_1 = arith.constant 0 : i32
    return %c0_i32, %c0_i32_0 : i32, i32
  }
  func.func @transform_3(%arg0: i32) -> (i32, i32) {
    %c0_i32 = arith.constant 0 : i32
    %c0_i32_0 = arith.constant 0 : i32
    %c0_i32_1 = arith.constant 0 : i32
    return %c0_i32, %c0_i32_0 : i32, i32
  }
  func.func @transform_4(%arg0: i32) -> (i32, i32) {
    %c0_i32 = arith.constant 0 : i32
    %c0_i32_0 = arith.constant 0 : i32
    %c0_i32_1 = arith.constant 0 : i32
    return %c0_i32, %c0_i32_0 : i32, i32
  }
  func.func @transform_5(%arg0: i32) -> (i32, i32) {
    %c0_i32 = arith.constant 0 : i32
    %c0_i32_0 = arith.constant 0 : i32
    %c0_i32_1 = arith.constant 0 : i32
    return %c0_i32, %c0_i32_0 : i32, i32
  }
  func.func @transform_6(%arg0: i32) -> (i32, i32) {
    %c0_i32 = arith.constant 0 : i32
    %c0_i32_0 = arith.constant 0 : i32
    %c0_i32_1 = arith.constant 0 : i32
    return %c0_i32, %c0_i32_0 : i32, i32
  }
  func.func @transform_7(%arg0: i32) -> (i32, i32) {
    %c0_i32 = arith.constant 0 : i32
    %c0_i32_0 = arith.constant 0 : i32
    %c0_i32_1 = arith.constant 0 : i32
    return %c0_i32, %c0_i32_0 : i32, i32
  }
  func.func @transform_8(%arg0: i32) -> (i32, i32) {
    %c0_i32 = arith.constant 0 : i32
    %c0_i32_0 = arith.constant 0 : i32
    %c0_i32_1 = arith.constant 0 : i32
    return %c0_i32, %c0_i32_0 : i32, i32
  }
  func.func @transform_9(%arg0: i32) -> (i32, i32) {
    %c0_i32 = arith.constant 0 : i32
    %c0_i32_0 = arith.constant 0 : i32
    %c0_i32_1 = arith.constant 0 : i32
    return %c0_i32, %c0_i32_0 : i32, i32
  }
  func.func @transform_10(%arg0: i32) -> (i32, i32) {
    %c0_i32 = arith.constant 0 : i32
    %c0_i32_0 = arith.constant 0 : i32
    %c0_i32_1 = arith.constant 0 : i32
    return %c0_i32, %c0_i32_0 : i32, i32
  }
  func.func @transform_11(%arg0: i32) -> (i32, i32) {
    %c0_i32 = arith.constant 0 : i32
    %c0_i32_0 = arith.constant 0 : i32
    %c0_i32_1 = arith.constant 0 : i32
    return %c0_i32, %c0_i32_0 : i32, i32
  }
  func.func @transform_12(%arg0: i32) -> (i32, i32) {
    %c0_i32 = arith.constant 0 : i32
    %c0_i32_0 = arith.constant 0 : i32
    %c0_i32_1 = arith.constant 0 : i32
    return %c0_i32, %c0_i32_0 : i32, i32
  }
  func.func @transform_13(%arg0: i32) -> (i32, i32) {
    %c0_i32 = arith.constant 0 : i32
    %c0_i32_0 = arith.constant 0 : i32
    return %arg0, %c0_i32 : i32, i32
  }
}

</mosaic_0001>

<bundles_post_ra>
// kernel: dqn_forward.1
= control target key start
LH: loop header
LB: loop body
LE: loop exit
PB: predicated region body
PF: predicated region fallthrough
CT: control target
= control target key end

     0   :  { %s1721_s25 = smov 0   ;;  %s2015_s0 = inlined_call_operand.vmem [shape: f32[256,128], index: 0, kind: input, shape index: {}]   ;;  %s2016_s1 = inlined_call_operand.vmem [shape: bf16[128,128], index: 1, kind: input, shape index: {}]   ;;  %s2017_s2 = inlined_call_operand.vmem [shape: f32[1,128], index: 2, kind: input, shape index: {}]   ;;  %s2018_s3 = inlined_call_operand.vmem [shape: bf16[128,128], index: 3, kind: input, shape index: {}]   ;;  %s2019_s4 = inlined_call_operand.vmem [shape: f32[1,128], index: 4, kind: input, shape index: {}]   ;;  %s2020_s5 = inlined_call_operand.vmem [shape: bf16[128,128], index: 5, kind: input, shape index: {}]   ;;  %s2021_s6 = inlined_call_operand.vmem [shape: f32[1,128], index: 6, kind: input, shape index: {}]   ;;  %s2022_s7 = inlined_call_operand.vmem [shape: bf16[128,128], index: 7, kind: input, shape index: {}]   ;;  %s2023_s8 = inlined_call_operand.vmem [shape: f32[1,128], index: 8, kind: input, shape index: {}]   ;;  %s2024_s9 = inlined_call_operand.vmem [shape: bf16[128,128], index: 9, kind: input, shape index: {}]   ;;  %s2025_s10 = inlined_call_operand.vmem [shape: f32[1,128], index: 10, kind: input, shape index: {}]   ;;  %s2026_s11 = inlined_call_operand.vmem [shape: bf16[128,128], index: 11, kind: input, shape index: {}]   ;;  %s2027_s12 = inlined_call_operand.vmem [shape: f32[1,128], index: 12, kind: input, shape index: {}]   ;;  %s2028_s13 = inlined_call_operand.vmem [shape: f32[256,128], index: 13, kind: output, shape index: {}]  }
   0x1 LB: > { %s1362_s26 = sadd.s32 4294967295, %s1649_s25   ;;  %p1366_p0 = scmp.ge.s32.totalorder %s1649_s25, 1  ;;  %s1649_s25 = sphi %s1721_s25, %s23_s25  }
   0x2   : > { %p388_p1 = scmp.lt.s32.totalorder %s1649_s25, 3 }
   0x4   : > { %p389_p2 = pnand %p1366_p0, %p388_p1 }
   0x5   : > { %s1367_s16 = sshll.u32 (!%p389_p2), %s1362_s26, 4 }
   0x6   : > { %392 = sbr.rel (%p389_p2) target bundleno = 1004 (0x3ec), region = 72  ;;  %p433_p3 = scmp.lt.s32.totalorder (!%p389_p2), %s1367_s16, 31 }
   0xb   : > { %v1572_v0 = vld [vmem:[%s2016_s1 + $0x38] sm:$0xff]  ;;  %v1571_v1 = vld [vmem:[%s2016_s1 + $0x30] sm:$0xff]  ;;  %v1570_v2 = vld [vmem:[%s2016_s1 + $0x28] sm:$0xff]  ;;  %s2030_s16 = smov (!%p433_p3, %s1367_s16), 31 }
   0xc   : > { %536 = vmatpush.bf16.msra.mxu0 %v1572_v0  ;;  %1613 = vmatpush.bf16.msra.mxu2 %v1572_v0  ;;  %v1569_v3 = vld [vmem:[%s2016_s1 + $0x20] sm:$0xff]  ;;  %v1568_v4 = vld [vmem:[%s2016_s1 + $0x18] sm:$0xff]  ;;  %v1567_v5 = vld [vmem:[%s2016_s1 + $0x10] sm:$0xff]  ;;  %s1368_s23 = sshll.u32 %s2030_s16, 3 }
   0xd   : > { %v1566_v6 = vld [vmem:[%s2016_s1 + $0x8] sm:$0xff]  ;;  %s1758_s29 = scalar_lea.vmem %s2015_s0, %s1368_s23  ;;  %v1565_v7 = vld [vmem:[%s2016_s1] sm:$0xff]  ;;  %v1580_v20 = vld [vmem:[%s2018_s3 + $0x38] sm:$0xff]  ;;  %s1994_s28 = scalar_lea.vmem %s2028_s13, %s1368_s23 }
   0xe   : > { %v444_v8 = vld [vmem:[%s1758_s29] sm:$0xff]  ;;  %v445_v9 = vld [vmem:[%s1758_s29 + $0x8] sm:$0xff]  ;;  %v446_v14 = vld [vmem:[%s1758_s29 + $0x10] sm:$0xff]  ;;  %677 = vmatpush.bf16.msra.mxu1 %v1580_v20  ;;  %1621 = vmatpush.bf16.msra.mxu3 %v1580_v20 }
   0xf   : > { %v460_v10 = vpack.c.bf16 %v445_v9, %v444_v8  ;;  %v452_v11 = vld [vmem:[%s1758_s29 + $0x40] sm:$0xff]  ;;  %v453_v12 = vld [vmem:[%s1758_s29 + $0x48] sm:$0xff]  ;;  %v447_v15 = vld [vmem:[%s1758_s29 + $0x18] sm:$0xff] }
  0x10   : > { %537 = vmatpush.bf16.msra.mxu0 %v1571_v1  ;;  %1614 = vmatpush.bf16.msra.mxu2 %v1571_v1  ;;  %v464_v13 = vpack.c.bf16 %v453_v12, %v452_v11  ;;  %v461_v16 = vpack.c.bf16 %v447_v15, %v446_v14  ;;  %v454_v17 = vld [vmem:[%s1758_s29 + $0x50] sm:$0xff]  ;;  %v455_v18 = vld [vmem:[%s1758_s29 + $0x58] sm:$0xff]  ;;  %v448_v22 = vld [vmem:[%s1758_s29 + $0x20] sm:$0xff] }
  0x11   : > { %v465_v19 = vpack.c.bf16 %v455_v18, %v454_v17  ;;  %v1579_v21 = vld [vmem:[%s2018_s3 + $0x30] sm:$0xff]  ;;  %v449_v23 = vld [vmem:[%s1758_s29 + $0x28] sm:$0xff]  ;;  %v456_v26 = vld [vmem:[%s1758_s29 + $0x60] sm:$0xff] }
  0x12   : > { %678 = vmatpush.bf16.msra.mxu1 %v1579_v21  ;;  %v1578_v24 = vld [vmem:[%s2018_s3 + $0x28] sm:$0xff]  ;;  %1622 = vmatpush.bf16.msra.mxu3 %v1579_v21  ;;  %v462_v25 = vpack.c.bf16 %v449_v23, %v448_v22  ;;  %v1577_v28 = vld [vmem:[%s2018_s3 + $0x20] sm:$0xff]  ;;  %v450_v30 = vld [vmem:[%s1758_s29 + $0x30] sm:$0xff] }
  0x13   : > { %v457_v27 = vld [vmem:[%s1758_s29 + $0x68] sm:$0xff]  ;;  %v451_v31 = vld [vmem:[%s1758_s29 + $0x38] sm:$0xff]  ;;  %v458_v33 = vld [vmem:[%s1758_s29 + $0x70] sm:$0xff] }
  0x14   : > { %538 = vmatpush.bf16.msra.mxu0 %v1570_v2  ;;  %1615 = vmatpush.bf16.msra.mxu2 %v1570_v2  ;;  %v466_v29 = vpack.c.bf16 %v457_v27, %v456_v26  ;;  %v463_v32 = vpack.c.bf16 %v451_v31, %v450_v30  ;;  %v459_v34 = vld [vmem:[%s1758_s29 + $0x78] sm:$0xff]  ;;  %v1575_v37 = vld [vmem:[%s2018_s3 + $0x10] sm:$0xff]  ;;  %v1574_v38 = vld [vmem:[%s2018_s3 + $0x8] sm:$0xff] }
  0x15   : > { %v467_v35 = vpack.c.bf16 %v459_v34, %v458_v33  ;;  %v1576_v36 = vld [vmem:[%s2018_s3 + $0x18] sm:$0xff]  ;;  %v1573_v39 = vld [vmem:[%s2018_s3] sm:$0xff]  ;;  %v1586_v11 = vld [vmem:[%s2020_s5 + $0x28] sm:$0xff] }
  0x16   : > { %679 = vmatpush.bf16.msra.mxu1 %v1578_v24  ;;  %1623 = vmatpush.bf16.msra.mxu3 %v1578_v24  ;;  %v1806_v41 = vld [vmem:[%s2017_s2] ss:$0 sm:$0xff]  ;;  %v1588_v0 = vld [vmem:[%s2020_s5 + $0x38] sm:$0xff]  ;;  %v1583_v23 = vld [vmem:[%s2020_s5 + $0x10] sm:$0xff] }
  0x17   : > { %v1585_v15 = vld [vmem:[%s2020_s5 + $0x20] sm:$0xff]  ;;  %v1584_v18 = vld [vmem:[%s2020_s5 + $0x18] sm:$0xff]  ;;  %v1582_v27 = vld [vmem:[%s2020_s5 + $0x8] sm:$0xff] }
  0x18   : > { %539 = vmatpush.bf16.msra.mxu0 %v1569_v3  ;;  %1616 = vmatpush.bf16.msra.mxu2 %v1569_v3 }
  0x1a   : > { %680 = vmatpush.bf16.msra.mxu1 %v1577_v28  ;;  %1624 = vmatpush.bf16.msra.mxu3 %v1577_v28 }
  0x1c   : > { %540 = vmatpush.bf16.msra.mxu0 %v1568_v4  ;;  %1617 = vmatpush.bf16.msra.mxu2 %v1568_v4 }
  0x1e   : > { %681 = vmatpush.bf16.msra.mxu1 %v1576_v36  ;;  %1625 = vmatpush.bf16.msra.mxu3 %v1576_v36 }
  0x20   : > { %541 = vmatpush.bf16.msra.mxu0 %v1567_v5  ;;  %1618 = vmatpush.bf16.msra.mxu2 %v1567_v5 }
  0x22   : > { %682 = vmatpush.bf16.msra.mxu1 %v1575_v37  ;;  %1626 = vmatpush.bf16.msra.mxu3 %v1575_v37 }
  0x24   : > { %542 = vmatpush.bf16.msra.mxu0 %v1566_v6  ;;  %1619 = vmatpush.bf16.msra.mxu2 %v1566_v6  ;;  %v1587_v6 = vld [vmem:[%s2020_s5 + $0x30] sm:$0xff] }
  0x26   : > { %683 = vmatpush.bf16.msra.mxu1 %v1574_v38  ;;  %1627 = vmatpush.bf16.msra.mxu3 %v1574_v38 }
  0x28   : > { %543 = vmatpush.bf16.msra.mxu0 %v1565_v7  ;;  %1620 = vmatpush.bf16.msra.mxu2 %v1565_v7 }
  0x2a   : > { %684 = vmatpush.bf16.msra.mxu1 %v1573_v39  ;;  %1628 = vmatpush.bf16.msra.mxu3 %v1573_v39 }
  0x2b   : > { %544 = vmatmul.bf16.vlgmr.msra.gmra.mxu0 %v460_v10  ;;  %564 = vmatmul.bf16.vlgmr.msra.gmra.mxu2 %v464_v13 }
  0x2c   : > { %818 = vmatpush.bf16.msrb.mxu2 %v1588_v0 }
  0x30   : > { %819 = vmatpush.bf16.msrb.mxu2 %v1587_v6 }
  0x34   : > { %820 = vmatpush.bf16.msrb.mxu2 %v1586_v11 }
  0x38   : > { %821 = vmatpush.bf16.msrb.mxu2 %v1585_v15 }
  0x3b   : > { %549 = vmatmul.bf16.gmra.mxu0 %v461_v16  ;;  %569 = vmatmul.bf16.gmra.mxu2 %v465_v19 }
  0x3c   : > { %822 = vmatpush.bf16.msrb.mxu2 %v1584_v18  ;;  %v1593_v18 = vld [vmem:[%s2022_s7 + $0x20] sm:$0xff] }
  0x40   : > { %823 = vmatpush.bf16.msrb.mxu2 %v1583_v23 }
  0x44   : > { %824 = vmatpush.bf16.msrb.mxu2 %v1582_v27  ;;  %v1591_v27 = vld [vmem:[%s2022_s7 + $0x10] sm:$0xff] }
  0x4b   : > { %554 = vmatmul.bf16.gmra.mxu0 %v462_v25  ;;  %574 = vmatmul.bf16.gmra.mxu2 %v466_v29 }
  0x5b   : > { %559 = vmatmul.bf16.gmra.mxu0 %v463_v32  ;;  %579 = vmatmul.bf16.gmra.mxu2 %v467_v35 }
  0xa8   : > { %v545_v40 = vpop.f32.mrf.mxu0 }
  0xa9   : > { %v546_v42 = vadd.f32 %v1806_v41, %v545_v40  ;;  %v1581_v40 = vld [vmem:[%s2020_s5] sm:$0xff] }
  0xaa   : > { %825 = vmatpush.bf16.msrb.mxu2 %v1581_v40 }
  0xab   : > { %v585_v46 = vmax.f32 %v546_v42, 0.0 }
  0xae   : > { %v565_v45 = vpop.f32.mrf.mxu2 }
  0xaf   : > { %v566_v49 = vadd.f32 %v1806_v41, %v565_v45 }
  0xb0   : > { %v547_v43 = vpop.f32.mrf.mxu0 }
  0xb1   : > { %v548_v44 = vadd.f32 %v1806_v41, %v547_v43  ;;  %v593_v52 = vmax.f32 %v566_v49, 0.0  ;;  %v1851_v43 = vld [vmem:[%s2019_s4] ss:$0 sm:$0xff] }
  0xb3   : > { %v586_v47 = vmax.f32 %v548_v44, 0.0 }
  0xb5   : > { %v601_v48 = vpack.c.bf16 %v586_v47, %v585_v46 }
  0xb6   : > { %v567_v51 = vpop.f32.mrf.mxu2 }
  0xb7   : > { %685 = vmatmul.bf16.vlgmr.msra.gmra.mxu1 %v601_v48  ;;  %v568_v53 = vadd.f32 %v1806_v41, %v567_v51 }
  0xb8   : > { %v550_v50 = vpop.f32.mrf.mxu0 }
  0xb9   : > { %v594_v54 = vmax.f32 %v568_v53, 0.0  ;;  %v551_v55 = vadd.f32 %v1806_v41, %v550_v50 }
  0xbb   : > { %v605_v56 = vpack.c.bf16 %v594_v54, %v593_v52  ;;  %v587_v60 = vmax.f32 %v551_v55, 0.0 }
  0xbd   : > { %705 = vmatmul.bf16.vlgmr.msra.gmra.mxu3 %v605_v56 }
  0xbe   : > { %v570_v59 = vpop.f32.mrf.mxu2 }
  0xbf   : > { %v571_v63 = vadd.f32 %v1806_v41, %v570_v59 }
  0xc0   : > { %v552_v57 = vpop.f32.mrf.mxu0 }
  0xc1   : > { %v553_v58 = vadd.f32 %v1806_v41, %v552_v57  ;;  %v595_v3 = vmax.f32 %v571_v63, 0.0 }
  0xc3   : > { %v588_v61 = vmax.f32 %v553_v58, 0.0 }
  0xc5   : > { %v602_v62 = vpack.c.bf16 %v588_v61, %v587_v60 }
  0xc6   : > { %v572_v2 = vpop.f32.mrf.mxu2 }
  0xc7   : > { %690 = vmatmul.bf16.gmra.mxu1 %v602_v62  ;;  %v573_v4 = vadd.f32 %v1806_v41, %v572_v2 }
  0xc8   : > { %v555_v1 = vpop.f32.mrf.mxu0 }
  0xc9   : > { %v596_v5 = vmax.f32 %v573_v4, 0.0  ;;  %v556_v7 = vadd.f32 %v1806_v41, %v555_v1 }
  0xcb   : > { %v606_v8 = vpack.c.bf16 %v596_v5, %v595_v3  ;;  %v589_v13 = vmax.f32 %v556_v7, 0.0 }
  0xcd   : > { %710 = vmatmul.bf16.gmra.mxu3 %v606_v8  ;;  %v1596_v8 = vld [vmem:[%s2022_s7 + $0x38] sm:$0xff] }
  0xce   : > { %v575_v12 = vpop.f32.mrf.mxu2  ;;  %959 = vmatpush.bf16.msrb.mxu3 %v1596_v8  ;;  %v1604_v8 = vld [vmem:[%s2024_s9 + $0x38] sm:$0xff] }
  0xcf   : > { %v576_v17 = vadd.f32 %v1806_v41, %v575_v12  ;;  %1100 = vmatpush.bf16.msrb.mxu0 %v1604_v8 }
  0xd0   : > { %v557_v9 = vpop.f32.mrf.mxu0 }
  0xd1   : > { %v558_v10 = vadd.f32 %v1806_v41, %v557_v9  ;;  %v597_v21 = vmax.f32 %v576_v17, 0.0  ;;  %v1594_v17 = vld [vmem:[%s2022_s7 + $0x28] sm:$0xff] }
  0xd3   : > { %v590_v14 = vmax.f32 %v558_v10, 0.0  ;;  %v1595_v10 = vld [vmem:[%s2022_s7 + $0x30] sm:$0xff] }
  0xd4   : > { %960 = vmatpush.bf16.msrb.mxu3 %v1595_v10 }
  0xd5   : > { %v603_v16 = vpack.c.bf16 %v590_v14, %v589_v13 }
  0xd6   : > { %v577_v20 = vpop.f32.mrf.mxu2 }
  0xd7   : > { %695 = vmatmul.bf16.gmra.mxu1 %v603_v16  ;;  %v578_v22 = vadd.f32 %v1806_v41, %v577_v20 }
  0xd8   : > { %v560_v19 = vpop.f32.mrf.mxu0  ;;  %961 = vmatpush.bf16.msrb.mxu3 %v1594_v17  ;;  %v1602_v17 = vld [vmem:[%s2024_s9 + $0x28] sm:$0xff] }
  0xd9   : > { %v598_v24 = vmax.f32 %v578_v22, 0.0  ;;  %v561_v25 = vadd.f32 %v1806_v41, %v560_v19 }
  0xdb   : > { %v607_v26 = vpack.c.bf16 %v598_v24, %v597_v21  ;;  %v591_v31 = vmax.f32 %v561_v25, 0.0 }
  0xdc   : > { %962 = vmatpush.bf16.msrb.mxu3 %v1593_v18 }
  0xdd   : > { %715 = vmatmul.bf16.gmra.mxu3 %v607_v26  ;;  %v1592_v26 = vld [vmem:[%s2022_s7 + $0x18] sm:$0xff] }
  0xde   : > { %v580_v30 = vpop.f32.mrf.mxu2 }
  0xdf   : > { %v581_v34 = vadd.f32 %v1806_v41, %v580_v30  ;;  %v1590_v30 = vld [vmem:[%s2022_s7 + $0x8] sm:$0xff] }
  0xe0   : > { %v562_v28 = vpop.f32.mrf.mxu0  ;;  %963 = vmatpush.bf16.msrb.mxu3 %v1592_v26 }
  0xe1   : > { %v563_v29 = vadd.f32 %v1806_v41, %v562_v28  ;;  %v599_v36 = vmax.f32 %v581_v34, 0.0 }
  0xe3   : > { %v592_v32 = vmax.f32 %v563_v29, 0.0 }
  0xe4   : > { %964 = vmatpush.bf16.msrb.mxu3 %v1591_v27  ;;  %v1599_v27 = vld [vmem:[%s2024_s9 + $0x10] sm:$0xff] }
  0xe5   : > { %v604_v33 = vpack.c.bf16 %v592_v32, %v591_v31 }
  0xe6   : > { %v582_v35 = vpop.f32.mrf.mxu2 }
  0xe7   : > { %700 = vmatmul.bf16.gmra.mxu1 %v604_v33  ;;  %v583_v37 = vadd.f32 %v1806_v41, %v582_v35 }
  0xe8   : > { %965 = vmatpush.bf16.msrb.mxu3 %v1590_v30 }
  0xe9   : > { %v600_v38 = vmax.f32 %v583_v37, 0.0 }
  0xeb   : > { %v608_v39 = vpack.c.bf16 %v600_v38, %v599_v36  ;;  %v1589_v38 = vld [vmem:[%s2022_s7] sm:$0xff] }
  0xec   : > { %966 = vmatpush.bf16.msrb.mxu3 %v1589_v38 }
  0xed   : > { %720 = vmatmul.bf16.gmra.mxu3 %v608_v39 }
 0x134   : > { %v686_v42 = vpop.f32.mrf.mxu1 }
 0x135   : > { %v687_v44 = vadd.f32 %v1851_v43, %v686_v42 }
 0x137   : > { %v726_v41 = vmax.f32 %v687_v44, 0.0 }
 0x13c   : > { %v688_v45 = vpop.f32.mrf.mxu1 }
 0x13d   : > { %v689_v46 = vadd.f32 %v1851_v43, %v688_v45  ;;  %v1896_v45 = vld [vmem:[%s2021_s6] ss:$0 sm:$0xff] }
 0x13f   : > { %v727_v47 = vmax.f32 %v689_v46, 0.0 }
 0x140   : > { %v706_v62 = vpop.f32.mrf.mxu3 }
 0x141   : > { %v742_v48 = vpack.c.bf16 %v727_v47, %v726_v41  ;;  %v707_v11 = vadd.f32 %v1851_v43, %v706_v62 }
 0x143   : > { %826 = vmatmul.bf16.vlgmr.msrb.gmra.mxu2 %v742_v48  ;;  %v734_v13 = vmax.f32 %v707_v11, 0.0 }
 0x144   : > { %v691_v49 = vpop.f32.mrf.mxu1 }
 0x145   : > { %v692_v50 = vadd.f32 %v1851_v43, %v691_v49 }
 0x147   : > { %v728_v53 = vmax.f32 %v692_v50, 0.0 }
 0x148   : > { %v708_v1 = vpop.f32.mrf.mxu3 }
 0x149   : > { %v709_v12 = vadd.f32 %v1851_v43, %v708_v1 }
 0x14b   : > { %v735_v14 = vmax.f32 %v709_v12, 0.0 }
 0x14c   : > { %v693_v51 = vpop.f32.mrf.mxu1 }
 0x14d   : > { %v694_v52 = vadd.f32 %v1851_v43, %v693_v51  ;;  %v746_v16 = vpack.c.bf16 %v735_v14, %v734_v13  ;;  %v1603_v14 = vld [vmem:[%s2024_s9 + $0x30] sm:$0xff] }
 0x14e   : > { %1101 = vmatpush.bf16.msrb.mxu0 %v1603_v14 }
 0x14f   : > { %v729_v54 = vmax.f32 %v694_v52, 0.0 }
 0x150   : > { %v711_v9 = vpop.f32.mrf.mxu3 }
 0x151   : > { %v743_v55 = vpack.c.bf16 %v729_v54, %v728_v53  ;;  %v712_v20 = vadd.f32 %v1851_v43, %v711_v9 }
 0x152   : > { %1102 = vmatpush.bf16.msrb.mxu0 %v1602_v17 }
 0x153   : > { %831 = vmatmul.bf16.gmra.mxu2 %v743_v55  ;;  %v736_v22 = vmax.f32 %v712_v20, 0.0 }
 0x154   : > { %v696_v56 = vpop.f32.mrf.mxu1 }
 0x155   : > { %v697_v57 = vadd.f32 %v1851_v43, %v696_v56 }
 0x157   : > { %v730_v60 = vmax.f32 %v697_v57, 0.0 }
 0x158   : > { %v713_v15 = vpop.f32.mrf.mxu3 }
 0x159   : > { %v714_v21 = vadd.f32 %v1851_v43, %v713_v15 }
 0x15b   : > { %v737_v23 = vmax.f32 %v714_v21, 0.0 }
 0x15c   : > { %v698_v58 = vpop.f32.mrf.mxu1 }
 0x15d   : > { %v699_v59 = vadd.f32 %v1851_v43, %v698_v58  ;;  %v747_v24 = vpack.c.bf16 %v737_v23, %v736_v22  ;;  %v1601_v23 = vld [vmem:[%s2024_s9 + $0x20] sm:$0xff] }
 0x15e   : > { %1103 = vmatpush.bf16.msrb.mxu0 %v1601_v23 }
 0x15f   : > { %v731_v61 = vmax.f32 %v699_v59, 0.0 }
 0x160   : > { %v716_v19 = vpop.f32.mrf.mxu3 }
 0x161   : > { %v744_v63 = vpack.c.bf16 %v731_v61, %v730_v60  ;;  %v717_v28 = vadd.f32 %v1851_v43, %v716_v19 }
 0x163   : > { %836 = vmatmul.bf16.gmra.mxu2 %v744_v63  ;;  %v738_v32 = vmax.f32 %v717_v28, 0.0  ;;  %v1598_v28 = vld [vmem:[%s2024_s9 + $0x8] sm:$0xff] }
 0x164   : > { %v701_v0 = vpop.f32.mrf.mxu1 }
 0x165   : > { %v702_v2 = vadd.f32 %v1851_v43, %v701_v0 }
 0x167   : > { %v732_v5 = vmax.f32 %v702_v2, 0.0 }
 0x168   : > { %v718_v25 = vpop.f32.mrf.mxu3 }
 0x169   : > { %v719_v29 = vadd.f32 %v1851_v43, %v718_v25  ;;  %v1600_v25 = vld [vmem:[%s2024_s9 + $0x18] sm:$0xff] }
 0x16a   : > { %1104 = vmatpush.bf16.msrb.mxu0 %v1600_v25  ;;  %v1608_v25 = vld [vmem:[%s2026_s11 + $0x18] sm:$0xff] }
 0x16b   : > { %v739_v33 = vmax.f32 %v719_v29, 0.0 }
 0x16c   : > { %v703_v3 = vpop.f32.mrf.mxu1 }
 0x16d   : > { %v704_v4 = vadd.f32 %v1851_v43, %v703_v3  ;;  %v748_v34 = vpack.c.bf16 %v739_v33, %v738_v32 }
 0x16e   : > { %1105 = vmatpush.bf16.msrb.mxu0 %v1599_v27  ;;  %v1607_v27 = vld [vmem:[%s2026_s11 + $0x10] sm:$0xff] }
 0x16f   : > { %v733_v6 = vmax.f32 %v704_v4, 0.0 }
 0x170   : > { %v721_v31 = vpop.f32.mrf.mxu3 }
 0x171   : > { %v745_v7 = vpack.c.bf16 %v733_v6, %v732_v5  ;;  %v722_v36 = vadd.f32 %v1851_v43, %v721_v31 }
 0x172   : > { %1106 = vmatpush.bf16.msrb.mxu0 %v1598_v28 }
 0x173   : > { %841 = vmatmul.bf16.gmra.mxu2 %v745_v7  ;;  %v740_v39 = vmax.f32 %v722_v36, 0.0  ;;  %v1597_v36 = vld [vmem:[%s2024_s9] sm:$0xff] }
 0x176   : > { %1107 = vmatpush.bf16.msrb.mxu0 %v1597_v36  ;;  %v1605_v36 = vld [vmem:[%s2026_s11] sm:$0xff] }
 0x178   : > { %v723_v35 = vpop.f32.mrf.mxu3 }
 0x179   : > { %v724_v37 = vadd.f32 %v1851_v43, %v723_v35 }
 0x17b   : > { %v741_v40 = vmax.f32 %v724_v37, 0.0 }
 0x17d   : > { %v749_v42 = vpack.c.bf16 %v741_v40, %v740_v39 }
 0x183   : > { %846 = vmatmul.bf16.gmra.mxu2 %v746_v16 }
 0x193   : > { %851 = vmatmul.bf16.gmra.mxu2 %v747_v24 }
 0x1a3   : > { %856 = vmatmul.bf16.gmra.mxu2 %v748_v34 }
 0x1b3   : > { %861 = vmatmul.bf16.gmra.mxu2 %v749_v42 }
 0x1c6   : > { %v827_v44 = vpop.f32.mrf.mxu2 }
 0x1c7   : > { %v828_v46 = vadd.f32 %v1896_v45, %v827_v44 }
 0x1c9   : > { %v867_v47 = vmax.f32 %v828_v46, 0.0 }
 0x1ce   : > { %v829_v41 = vpop.f32.mrf.mxu2 }
 0x1cf   : > { %v830_v43 = vadd.f32 %v1896_v45, %v829_v41  ;;  %v1941_v41 = vld [vmem:[%s2023_s8] ss:$0 sm:$0xff] }
 0x1d1   : > { %v868_v48 = vmax.f32 %v830_v43, 0.0 }
 0x1d3   : > { %v883_v49 = vpack.c.bf16 %v868_v48, %v867_v47 }
 0x1d5   : > { %967 = vmatmul.bf16.vlgmr.msrb.gmra.mxu3 %v883_v49 }
 0x1d6   : > { %v832_v50 = vpop.f32.mrf.mxu2 }
 0x1d7   : > { %v833_v51 = vadd.f32 %v1896_v45, %v832_v50 }
 0x1d9   : > { %v869_v54 = vmax.f32 %v833_v51, 0.0 }
 0x1de   : > { %v834_v52 = vpop.f32.mrf.mxu2 }
 0x1df   : > { %v835_v53 = vadd.f32 %v1896_v45, %v834_v52 }
 0x1e1   : > { %v870_v55 = vmax.f32 %v835_v53, 0.0 }
 0x1e3   : > { %v884_v56 = vpack.c.bf16 %v870_v55, %v869_v54 }
 0x1e5   : > { %972 = vmatmul.bf16.gmra.mxu3 %v884_v56 }
 0x1e6   : > { %v837_v57 = vpop.f32.mrf.mxu2 }
 0x1e7   : > { %v838_v58 = vadd.f32 %v1896_v45, %v837_v57 }
 0x1e9   : > { %v871_v61 = vmax.f32 %v838_v58, 0.0 }
 0x1ee   : > { %v839_v59 = vpop.f32.mrf.mxu2 }
 0x1ef   : > { %v840_v60 = vadd.f32 %v1896_v45, %v839_v59 }
 0x1f1   : > { %v872_v62 = vmax.f32 %v840_v60, 0.0 }
 0x1f3   : > { %v885_v63 = vpack.c.bf16 %v872_v62, %v871_v61 }
 0x1f5   : > { %977 = vmatmul.bf16.gmra.mxu3 %v885_v63 }
 0x1f6   : > { %v842_v0 = vpop.f32.mrf.mxu2 }
 0x1f7   : > { %v843_v1 = vadd.f32 %v1896_v45, %v842_v0 }
 0x1f9   : > { %v873_v4 = vmax.f32 %v843_v1, 0.0 }
 0x1fe   : > { %v844_v2 = vpop.f32.mrf.mxu2 }
 0x1ff   : > { %v845_v3 = vadd.f32 %v1896_v45, %v844_v2 }
 0x201   : > { %v874_v5 = vmax.f32 %v845_v3, 0.0 }
 0x203   : > { %v886_v6 = vpack.c.bf16 %v874_v5, %v873_v4 }
 0x205   : > { %982 = vmatmul.bf16.gmra.mxu3 %v886_v6 }
 0x206   : > { %v847_v7 = vpop.f32.mrf.mxu2 }
 0x207   : > { %v848_v9 = vadd.f32 %v1896_v45, %v847_v7  ;;  %v1612_v7 = vld [vmem:[%s2026_s11 + $0x38] sm:$0xff] }
 0x208   : > { %1241 = vmatpush.bf16.msrb.mxu1 %v1612_v7 }
 0x209   : > { %v875_v12 = vmax.f32 %v848_v9, 0.0 }
 0x20e   : > { %v849_v10 = vpop.f32.mrf.mxu2 }
 0x20f   : > { %v850_v11 = vadd.f32 %v1896_v45, %v849_v10  ;;  %v1611_v10 = vld [vmem:[%s2026_s11 + $0x30] sm:$0xff] }
 0x210   : > { %1242 = vmatpush.bf16.msrb.mxu1 %v1611_v10 }
 0x211   : > { %v876_v13 = vmax.f32 %v850_v11, 0.0 }
 0x213   : > { %v887_v15 = vpack.c.bf16 %v876_v13, %v875_v12 }
 0x215   : > { %987 = vmatmul.bf16.gmra.mxu3 %v887_v15 }
 0x216   : > { %v852_v16 = vpop.f32.mrf.mxu2 }
 0x217   : > { %v853_v18 = vadd.f32 %v1896_v45, %v852_v16  ;;  %v1610_v16 = vld [vmem:[%s2026_s11 + $0x28] sm:$0xff] }
 0x218   : > { %1243 = vmatpush.bf16.msrb.mxu1 %v1610_v16 }
 0x219   : > { %v877_v21 = vmax.f32 %v853_v18, 0.0 }
 0x21e   : > { %v854_v19 = vpop.f32.mrf.mxu2 }
 0x21f   : > { %v855_v20 = vadd.f32 %v1896_v45, %v854_v19  ;;  %v1609_v19 = vld [vmem:[%s2026_s11 + $0x20] sm:$0xff] }
 0x220   : > { %1244 = vmatpush.bf16.msrb.mxu1 %v1609_v19 }
 0x221   : > { %v878_v22 = vmax.f32 %v855_v20, 0.0 }
 0x223   : > { %v888_v24 = vpack.c.bf16 %v878_v22, %v877_v21 }
 0x224   : > { %1245 = vmatpush.bf16.msrb.mxu1 %v1608_v25 }
 0x225   : > { %992 = vmatmul.bf16.gmra.mxu3 %v888_v24 }
 0x226   : > { %v857_v26 = vpop.f32.mrf.mxu2 }
 0x227   : > { %v858_v29 = vadd.f32 %v1896_v45, %v857_v26 }
 0x228   : > { %1246 = vmatpush.bf16.msrb.mxu1 %v1607_v27 }
 0x229   : > { %v879_v32 = vmax.f32 %v858_v29, 0.0  ;;  %v1606_v29 = vld [vmem:[%s2026_s11 + $0x8] sm:$0xff] }
 0x22c   : > { %1247 = vmatpush.bf16.msrb.mxu1 %v1606_v29 }
 0x22e   : > { %v859_v30 = vpop.f32.mrf.mxu2 }
 0x22f   : > { %v860_v31 = vadd.f32 %v1896_v45, %v859_v30 }
 0x230   : > { %1248 = vmatpush.bf16.msrb.mxu1 %v1605_v36 }
 0x231   : > { %v880_v33 = vmax.f32 %v860_v31, 0.0 }
 0x233   : > { %v889_v34 = vpack.c.bf16 %v880_v33, %v879_v32 }
 0x235   : > { %997 = vmatmul.bf16.gmra.mxu3 %v889_v34 }
 0x236   : > { %v862_v35 = vpop.f32.mrf.mxu2 }
 0x237   : > { %v863_v37 = vadd.f32 %v1896_v45, %v862_v35 }
 0x239   : > { %v881_v40 = vmax.f32 %v863_v37, 0.0 }
 0x23e   : > { %v864_v38 = vpop.f32.mrf.mxu2 }
 0x23f   : > { %v865_v39 = vadd.f32 %v1896_v45, %v864_v38 }
 0x241   : > { %v882_v42 = vmax.f32 %v865_v39, 0.0 }
 0x243   : > { %v890_v44 = vpack.c.bf16 %v882_v42, %v881_v40 }
 0x245   : > { %1002 = vmatmul.bf16.gmra.mxu3 %v890_v44 }
 0x258   : > { %v968_v46 = vpop.f32.mrf.mxu3 }
 0x259   : > { %v969_v43 = vadd.f32 %v1941_v41, %v968_v46 }
 0x25b   : > { %v1008_v49 = vmax.f32 %v969_v43, 0.0 }
 0x260   : > { %v970_v47 = vpop.f32.mrf.mxu3 }
 0x261   : > { %v971_v48 = vadd.f32 %v1941_v41, %v970_v47  ;;  %v1641_v47 = vld [vmem:[%s2025_s10] ss:$0 sm:$0xff] }
 0x263   : > { %v1009_v50 = vmax.f32 %v971_v48, 0.0 }
 0x265   : > { %v1024_v51 = vpack.c.bf16 %v1009_v50, %v1008_v49 }
 0x267   : > { %1108 = vmatmul.bf16.vlgmr.msrb.gmra.mxu0 %v1024_v51 }
 0x268   : > { %v973_v45 = vpop.f32.mrf.mxu3 }
 0x269   : > { %v974_v52 = vadd.f32 %v1941_v41, %v973_v45 }
 0x26b   : > { %v1010_v55 = vmax.f32 %v974_v52, 0.0 }
 0x270   : > { %v975_v53 = vpop.f32.mrf.mxu3 }
 0x271   : > { %v976_v54 = vadd.f32 %v1941_v41, %v975_v53 }
 0x273   : > { %v1011_v56 = vmax.f32 %v976_v54, 0.0 }
 0x275   : > { %v1025_v57 = vpack.c.bf16 %v1011_v56, %v1010_v55 }
 0x277   : > { %1113 = vmatmul.bf16.gmra.mxu0 %v1025_v57 }
 0x278   : > { %v978_v58 = vpop.f32.mrf.mxu3 }
 0x279   : > { %v979_v59 = vadd.f32 %v1941_v41, %v978_v58 }
 0x27b   : > { %v1012_v62 = vmax.f32 %v979_v59, 0.0 }
 0x280   : > { %v980_v60 = vpop.f32.mrf.mxu3 }
 0x281   : > { %v981_v61 = vadd.f32 %v1941_v41, %v980_v60 }
 0x283   : > { %v1013_v63 = vmax.f32 %v981_v61, 0.0 }
 0x285   : > { %v1026_v0 = vpack.c.bf16 %v1013_v63, %v1012_v62 }
 0x287   : > { %1118 = vmatmul.bf16.gmra.mxu0 %v1026_v0 }
 0x288   : > { %v983_v1 = vpop.f32.mrf.mxu3 }
 0x289   : > { %v984_v2 = vadd.f32 %v1941_v41, %v983_v1 }
 0x28b   : > { %v1014_v5 = vmax.f32 %v984_v2, 0.0 }
 0x290   : > { %v985_v3 = vpop.f32.mrf.mxu3 }
 0x291   : > { %v986_v4 = vadd.f32 %v1941_v41, %v985_v3 }
 0x293   : > { %v1015_v6 = vmax.f32 %v986_v4, 0.0 }
 0x295   : > { %v1027_v8 = vpack.c.bf16 %v1015_v6, %v1014_v5 }
 0x297   : > { %1123 = vmatmul.bf16.gmra.mxu0 %v1027_v8 }
 0x298   : > { %v988_v9 = vpop.f32.mrf.mxu3 }
 0x299   : > { %v989_v11 = vadd.f32 %v1941_v41, %v988_v9 }
 0x29b   : > { %v1016_v14 = vmax.f32 %v989_v11, 0.0 }
 0x2a0   : > { %v990_v12 = vpop.f32.mrf.mxu3 }
 0x2a1   : > { %v991_v13 = vadd.f32 %v1941_v41, %v990_v12 }
 0x2a3   : > { %v1017_v15 = vmax.f32 %v991_v13, 0.0 }
 0x2a5   : > { %v1028_v17 = vpack.c.bf16 %v1017_v15, %v1016_v14 }
 0x2a7   : > { %1128 = vmatmul.bf16.gmra.mxu0 %v1028_v17 }
 0x2a8   : > { %v993_v18 = vpop.f32.mrf.mxu3 }
 0x2a9   : > { %v994_v20 = vadd.f32 %v1941_v41, %v993_v18 }
 0x2ab   : > { %v1018_v23 = vmax.f32 %v994_v20, 0.0 }
 0x2b0   : > { %v995_v21 = vpop.f32.mrf.mxu3 }
 0x2b1   : > { %v996_v22 = vadd.f32 %v1941_v41, %v995_v21 }
 0x2b3   : > { %v1019_v24 = vmax.f32 %v996_v22, 0.0 }
 0x2b5   : > { %v1029_v26 = vpack.c.bf16 %v1019_v24, %v1018_v23 }
 0x2b7   : > { %1133 = vmatmul.bf16.gmra.mxu0 %v1029_v26 }
 0x2b8   : > { %v998_v28 = vpop.f32.mrf.mxu3 }
 0x2b9   : > { %v999_v30 = vadd.f32 %v1941_v41, %v998_v28 }
 0x2bb   : > { %v1020_v33 = vmax.f32 %v999_v30, 0.0 }
 0x2c0   : > { %v1000_v31 = vpop.f32.mrf.mxu3 }
 0x2c1   : > { %v1001_v32 = vadd.f32 %v1941_v41, %v1000_v31 }
 0x2c3   : > { %v1021_v34 = vmax.f32 %v1001_v32, 0.0 }
 0x2c5   : > { %v1030_v35 = vpack.c.bf16 %v1021_v34, %v1020_v33 }
 0x2c7   : > { %1138 = vmatmul.bf16.gmra.mxu0 %v1030_v35 }
 0x2c8   : > { %v1003_v37 = vpop.f32.mrf.mxu3 }
 0x2c9   : > { %v1004_v38 = vadd.f32 %v1941_v41, %v1003_v37  ;;  %v1642_v37 = vld [vmem:[%s2027_s12] ss:$0 sm:$0xff] }
 0x2cb   : > { %v1022_v42 = vmax.f32 %v1004_v38, 0.0 }
 0x2d0   : > { %v1005_v39 = vpop.f32.mrf.mxu3 }
 0x2d1   : > { %v1006_v40 = vadd.f32 %v1941_v41, %v1005_v39 }
 0x2d3   : > { %v1023_v44 = vmax.f32 %v1006_v40, 0.0 }
 0x2d5   : > { %v1031_v46 = vpack.c.bf16 %v1023_v44, %v1022_v42 }
 0x2d7   : > { %1143 = vmatmul.bf16.gmra.mxu0 %v1031_v46 }
 0x2e4   : > { %v1109_v43 = vpop.f32.mrf.mxu0 }
 0x2e5   : > { %v1110_v48 = vadd.f32 %v1641_v47, %v1109_v43 }
 0x2e7   : > { %v1149_v51 = vmax.f32 %v1110_v48, 0.0 }
 0x2ec   : > { %v1111_v49 = vpop.f32.mrf.mxu0 }
 0x2ed   : > { %v1112_v50 = vadd.f32 %v1641_v47, %v1111_v49 }
 0x2ef   : > { %v1150_v45 = vmax.f32 %v1112_v50, 0.0 }
 0x2f1   : > { %v1165_v52 = vpack.c.bf16 %v1150_v45, %v1149_v51 }
 0x2f3   : > { %1249 = vmatmul.bf16.vlgmr.msrb.gmra.mxu1 %v1165_v52 }
 0x2f4   : > { %v1114_v53 = vpop.f32.mrf.mxu0 }
 0x2f5   : > { %v1115_v54 = vadd.f32 %v1641_v47, %v1114_v53 }
 0x2f7   : > { %v1151_v56 = vmax.f32 %v1115_v54, 0.0 }
 0x2fc   : > { %v1116_v55 = vpop.f32.mrf.mxu0 }
 0x2fd   : > { %v1117_v41 = vadd.f32 %v1641_v47, %v1116_v55 }
 0x2ff   : > { %v1152_v57 = vmax.f32 %v1117_v41, 0.0 }
 0x301   : > { %v1166_v58 = vpack.c.bf16 %v1152_v57, %v1151_v56 }
 0x303   : > { %1254 = vmatmul.bf16.gmra.mxu1 %v1166_v58 }
 0x304   : > { %v1119_v59 = vpop.f32.mrf.mxu0 }
 0x305   : > { %v1120_v60 = vadd.f32 %v1641_v47, %v1119_v59 }
 0x307   : > { %v1153_v63 = vmax.f32 %v1120_v60, 0.0 }
 0x30c   : > { %v1121_v61 = vpop.f32.mrf.mxu0 }
 0x30d   : > { %v1122_v62 = vadd.f32 %v1641_v47, %v1121_v61 }
 0x30f   : > { %v1154_v0 = vmax.f32 %v1122_v62, 0.0 }
 0x311   : > { %v1167_v1 = vpack.c.bf16 %v1154_v0, %v1153_v63 }
 0x313   : > { %1259 = vmatmul.bf16.gmra.mxu1 %v1167_v1 }
 0x314   : > { %v1124_v2 = vpop.f32.mrf.mxu0 }
 0x315   : > { %v1125_v3 = vadd.f32 %v1641_v47, %v1124_v2 }
 0x317   : > { %v1155_v6 = vmax.f32 %v1125_v3, 0.0 }
 0x31c   : > { %v1126_v4 = vpop.f32.mrf.mxu0 }
 0x31d   : > { %v1127_v5 = vadd.f32 %v1641_v47, %v1126_v4 }
 0x31f   : > { %v1156_v7 = vmax.f32 %v1127_v5, 0.0 }
 0x321   : > { %v1168_v8 = vpack.c.bf16 %v1156_v7, %v1155_v6 }
 0x323   : > { %1264 = vmatmul.bf16.gmra.mxu1 %v1168_v8 }
 0x324   : > { %v1129_v9 = vpop.f32.mrf.mxu0 }
 0x325   : > { %v1130_v10 = vadd.f32 %v1641_v47, %v1129_v9 }
 0x327   : > { %v1157_v13 = vmax.f32 %v1130_v10, 0.0 }
 0x32c   : > { %v1131_v11 = vpop.f32.mrf.mxu0 }
 0x32d   : > { %v1132_v12 = vadd.f32 %v1641_v47, %v1131_v11 }
 0x32f   : > { %v1158_v14 = vmax.f32 %v1132_v12, 0.0 }
 0x331   : > { %v1169_v15 = vpack.c.bf16 %v1158_v14, %v1157_v13 }
 0x333   : > { %1269 = vmatmul.bf16.gmra.mxu1 %v1169_v15 }
 0x334   : > { %v1134_v16 = vpop.f32.mrf.mxu0 }
 0x335   : > { %v1135_v17 = vadd.f32 %v1641_v47, %v1134_v16 }
 0x337   : > { %v1159_v20 = vmax.f32 %v1135_v17, 0.0 }
 0x33c   : > { %v1136_v18 = vpop.f32.mrf.mxu0 }
 0x33d   : > { %v1137_v19 = vadd.f32 %v1641_v47, %v1136_v18 }
 0x33f   : > { %v1160_v21 = vmax.f32 %v1137_v19, 0.0 }
 0x341   : > { %v1170_v22 = vpack.c.bf16 %v1160_v21, %v1159_v20 }
 0x343   : > { %1274 = vmatmul.bf16.gmra.mxu1 %v1170_v22 }
 0x344   : > { %v1139_v23 = vpop.f32.mrf.mxu0 }
 0x345   : > { %v1140_v24 = vadd.f32 %v1641_v47, %v1139_v23 }
 0x347   : > { %v1161_v27 = vmax.f32 %v1140_v24, 0.0 }
 0x34c   : > { %v1141_v25 = vpop.f32.mrf.mxu0 }
 0x34d   : > { %v1142_v26 = vadd.f32 %v1641_v47, %v1141_v25 }
 0x34f   : > { %v1162_v28 = vmax.f32 %v1142_v26, 0.0 }
 0x351   : > { %v1171_v29 = vpack.c.bf16 %v1162_v28, %v1161_v27 }
 0x353   : > { %1279 = vmatmul.bf16.gmra.mxu1 %v1171_v29 }
 0x354   : > { %v1144_v30 = vpop.f32.mrf.mxu0 }
 0x355   : > { %v1145_v31 = vadd.f32 %v1641_v47, %v1144_v30 }
 0x357   : > { %v1163_v34 = vmax.f32 %v1145_v31, 0.0 }
 0x35c   : > { %v1146_v32 = vpop.f32.mrf.mxu0 }
 0x35d   : > { %v1147_v33 = vadd.f32 %v1641_v47, %v1146_v32 }
 0x35f   : > { %v1164_v35 = vmax.f32 %v1147_v33, 0.0 }
 0x361   : > { %v1172_v36 = vpack.c.bf16 %v1164_v35, %v1163_v34 }
 0x363   : > { %1284 = vmatmul.bf16.gmra.mxu1 %v1172_v36 }
 0x370   : > { %v1250_v38 = vpop.f32.mrf.mxu1 }
 0x371   : > { %v1251_v39 = vadd.f32 %v1642_v37, %v1250_v38 }
 0x373   : > { %1290 = vst [vmem:[%s1994_s28] sm:$0xff] %v1251_v39 }
 0x378   : > { %v1252_v40 = vpop.f32.mrf.mxu1 }
 0x379   : > { %v1253_v42 = vadd.f32 %v1642_v37, %v1252_v40 }
 0x37b   : > { %1291 = vst [vmem:[%s1994_s28 + $0x8] sm:$0xff] %v1253_v42 }
 0x380   : > { %v1255_v44 = vpop.f32.mrf.mxu1 }
 0x381   : > { %v1256_v46 = vadd.f32 %v1642_v37, %v1255_v44 }
 0x383   : > { %1292 = vst [vmem:[%s1994_s28 + $0x10] sm:$0xff] %v1256_v46 }
 0x388   : > { %v1257_v43 = vpop.f32.mrf.mxu1 }
 0x389   : > { %v1258_v47 = vadd.f32 %v1642_v37, %v1257_v43 }
 0x38b   : > { %1293 = vst [vmem:[%s1994_s28 + $0x18] sm:$0xff] %v1258_v47 }
 0x390   : > { %v1260_v48 = vpop.f32.mrf.mxu1 }
 0x391   : > { %v1261_v49 = vadd.f32 %v1642_v37, %v1260_v48 }
 0x393   : > { %1294 = vst [vmem:[%s1994_s28 + $0x20] sm:$0xff] %v1261_v49 }
 0x398   : > { %v1262_v50 = vpop.f32.mrf.mxu1 }
 0x399   : > { %v1263_v51 = vadd.f32 %v1642_v37, %v1262_v50 }
 0x39b   : > { %1295 = vst [vmem:[%s1994_s28 + $0x28] sm:$0xff] %v1263_v51 }
 0x3a0   : > { %v1265_v45 = vpop.f32.mrf.mxu1 }
 0x3a1   : > { %v1266_v52 = vadd.f32 %v1642_v37, %v1265_v45 }
 0x3a3   : > { %1296 = vst [vmem:[%s1994_s28 + $0x30] sm:$0xff] %v1266_v52 }
 0x3a8   : > { %v1267_v53 = vpop.f32.mrf.mxu1 }
 0x3a9   : > { %v1268_v54 = vadd.f32 %v1642_v37, %v1267_v53 }
 0x3ab   : > { %1297 = vst [vmem:[%s1994_s28 + $0x38] sm:$0xff] %v1268_v54 }
 0x3b0   : > { %v1270_v55 = vpop.f32.mrf.mxu1 }
 0x3b1   : > { %v1271_v41 = vadd.f32 %v1642_v37, %v1270_v55 }
 0x3b3   : > { %1298 = vst [vmem:[%s1994_s28 + $0x40] sm:$0xff] %v1271_v41 }
 0x3b8   : > { %v1272_v56 = vpop.f32.mrf.mxu1 }
 0x3b9   : > { %v1273_v57 = vadd.f32 %v1642_v37, %v1272_v56 }
 0x3bb   : > { %1299 = vst [vmem:[%s1994_s28 + $0x48] sm:$0xff] %v1273_v57 }
 0x3c0   : > { %v1275_v58 = vpop.f32.mrf.mxu1 }
 0x3c1   : > { %v1276_v59 = vadd.f32 %v1642_v37, %v1275_v58 }
 0x3c3   : > { %1300 = vst [vmem:[%s1994_s28 + $0x50] sm:$0xff] %v1276_v59 }
 0x3c8   : > { %v1277_v60 = vpop.f32.mrf.mxu1 }
 0x3c9   : > { %v1278_v61 = vadd.f32 %v1642_v37, %v1277_v60 }
 0x3cb   : > { %1301 = vst [vmem:[%s1994_s28 + $0x58] sm:$0xff] %v1278_v61 }
 0x3d0   : > { %v1280_v62 = vpop.f32.mrf.mxu1 }
 0x3d1   : > { %v1281_v63 = vadd.f32 %v1642_v37, %v1280_v62 }
 0x3d3   : > { %1302 = vst [vmem:[%s1994_s28 + $0x60] sm:$0xff] %v1281_v63 }
 0x3d8   : > { %v1282_v0 = vpop.f32.mrf.mxu1 }
 0x3d9   : > { %v1283_v1 = vadd.f32 %v1642_v37, %v1282_v0 }
 0x3db   : > { %1303 = vst [vmem:[%s1994_s28 + $0x68] sm:$0xff] %v1283_v1 }
 0x3e0   : > { %v1285_v2 = vpop.f32.mrf.mxu1 }
 0x3e1   : > { %v1286_v3 = vadd.f32 %v1642_v37, %v1285_v2 }
 0x3e3   : > { %1304 = vst [vmem:[%s1994_s28 + $0x70] sm:$0xff] %v1286_v3 }
 0x3e8   : > { %v1287_v4 = vpop.f32.mrf.mxu1 }
 0x3e9   : > { %v1288_v5 = vadd.f32 %v1642_v37, %v1287_v4 }
 0x3eb   : > { %1305 = vst [vmem:[%s1994_s28 + $0x78] sm:$0xff] %v1288_v5 }
 0x3ec PF: > { %s23_s25 = sadd.s32 1, %s1649_s25  }
 0x3ed   : > { %p20_p4 = scmp.ge.s32.totalorder %s23_s25, 4  }
 0x3ef   :  { %22 = sbr.rel (!%p20_p4) target bundleno = 1 (0x1), region = 102 }

</bundles_post_ra>
